<compile_context>
chip_gen: v7x
topology: tpu7x:2x2x1
jax: 0.10.0
libtpu: 0.0.40
codegen_flags: <defaults>
</compile_context>

<pallas_src>
import functools

import jax
import jax.numpy as jnp
import numpy as np
from jax import lax
from jax.experimental import pallas as pl
from jax.experimental.pallas import tpu as pltpu


# ----------------------------------------------------------------------------
# Pallas kernel: one grid step == (batch element, edge tile).
# ----------------------------------------------------------------------------
def _gat_kernel(x_ref, rel_ref, src_ref, trg_ref, wf_ref, w_ref, bias_ref,
                out_ref, node_ref, m_ref, acc_ref):
    t = pl.program_id(1)
    last_t = pl.num_programs(1) - 1

    f32, bf16 = jnp.float32, jnp.bfloat16
    hf = bias_ref.shape[1]            # H * F_out
    f_in = x_ref.shape[2]             # F_in (== hf, skip-connection requirement)
    n_nodes = x_ref.shape[1]          # N
    te = rel_ref.shape[1]             # edge-tile size
    seg = wf_ref.shape[1] // 3        # 128-aligned lane width of each segment

    # ---- per-batch init (tile 0): fused projection, shift, zero accumulator -
    @pl.when(t == 0)
    def _():
        # bf16 operands on the MXU, f32 accumulation.
        node_f32 = jnp.dot(x_ref[0].astype(bf16), wf_ref[...],
                           preferred_element_type=f32)           # (N, 3*seg)
        node_ref[...] = node_f32.astype(bf16)                     # [proj|s_src|s_trg]
        # Per-head stability shift (upper bound of every edge logit for that
        # head); it cancels exactly in the softmax.  Hoisted out of the loop.
        m_raw = (jnp.max(node_f32[:, seg:2 * seg], axis=0, keepdims=True)
                 + jnp.max(node_f32[:, 2 * seg:], axis=0, keepdims=True))
        m_ref[...] = jnp.where(m_raw > 0.0, m_raw, 0.2 * m_raw)   # leaky monotone
        acc_ref[...] = jnp.zeros_like(acc_ref)

    node_all = node_ref[...]          # (N, 3*seg) bf16
    m = m_ref[...]                    # (1, seg)   f32

    # ---- per-edge-tile work --------------------------------------------------
    src = src_ref[0]                  # (te, 1) int32
    trg = trg_ref[0]

    # single fused one-hot gather: rows [0,te) by src, rows [te,2te) by trg
    idx = jnp.concatenate([src, trg], axis=0)                         # (2*te, 1)
    oh = (idx == lax.broadcasted_iota(jnp.int32, (2 * te, n_nodes), 1)
          ).astype(bf16)                                              # (2*te, N)
    gath = jnp.dot(oh, node_all, preferred_element_type=f32)          # (2*te, 3*seg)

    lifted = gath[:te, :seg]                               # proj[src]      (te, seg)
    s = gath[:te, seg:2 * seg] + gath[te:, 2 * seg:]       # s_src[src]+s_trg[trg]
    s = jnp.where(s > 0.0, s, 0.2 * s)                     # leakyReLU(0.2)
    e_w = jnp.exp(s - m)                                   # (te, seg), <= 1

    # raw rel tile goes straight into the third accumulator segment; its
    # projection is hoisted to the finalize step (one matmul per batch).
    rel_t = rel_ref[0]                                     # (te, f_in) bf16
    pad_w = seg - f_in
    if pad_w:
        rel_t = jnp.concatenate(
            [rel_t, jnp.zeros((te, pad_w), dtype=bf16)], axis=1)

    # single fused one-hot scatter-add onto target nodes (reuses the trg rows
    # of the gather one-hot):
    #   lanes [0,seg)     softmax denominator (per head, lane-expanded)
    #   lanes [seg,2seg)  softmax numerator  sum_e e * proj[src]
    #   lanes [2seg,3seg) sum_e rel (raw)
    scat_rhs = jnp.concatenate(
        [e_w.astype(bf16), (lifted * e_w).astype(bf16), rel_t], axis=1)
    oh_trg = oh[te:, :]                                    # (te, N) bf16, reused
    acc_ref[...] += lax.dot_general(oh_trg, scat_rhs,
                                    (((0,), (0,)), ((), ())),
                                    preferred_element_type=f32)    # (N, 3*seg)

    # ---- finalize: normalize, rel projection, skip, bias, ELU, store ---------
    @pl.when(t == last_t)
    def _():
        acc = acc_ref[...]
        denom = acc[:, :hf]
        num = acc[:, seg:seg + hf]
        rel_agg = acc[:, 2 * seg:2 * seg + f_in]
        rel_proj = jnp.dot(rel_agg, w_ref[...], preferred_element_type=f32)
        # zero-in-degree nodes: num == denom == 0  ->  0 * recip(1e-16) == 0
        out = num * pl.reciprocal(denom + 1e-16, approx=True) + rel_proj
        out = out + x_ref[0] + bias_ref[...]       # skip (F_in == H*F_out) + bias
        out = jnp.where(out > 0.0, out,
                        jnp.exp(jnp.minimum(out, 0.0)) - 1.0)      # ELU(alpha=1)
        pad = out_ref.shape[2] - hf
        if pad:                                    # lane-dense (unmasked) store
            out = jnp.concatenate(
                [out, jnp.zeros((n_nodes, pad), dtype=out.dtype)], axis=1)
        out_ref[0] = out.astype(out_ref.dtype)


# ----------------------------------------------------------------------------
# Wrapper
# ----------------------------------------------------------------------------
@functools.partial(jax.jit,
                   static_argnames=("num_heads", "num_out_features", "edge_tile"))
def gat_layer(x, edge_index, rel, w, scoring_src, scoring_trg, bias,
              *, num_heads, num_out_features, edge_tile=None):
    b, n, f_in = x.shape
    e = edge_index.shape[2]
    h, fo = num_heads, num_out_features
    hf = h * fo
    assert f_in == hf, "skip connection assumes F_in == H * F_out"
    # NOTE(v7x): keep the batch a multiple of 2 (one per TensorCore); an odd /
    # unit batch leaves one core idle.

    # Edge tile: big enough to fill the MXU contraction and amortize grid
    # overhead, small enough that the one-hot transients fit VMEM.
    if edge_tile is None:
        te = e if e <= 512 else next(
            (c for c in (512, 256, 128, 64, 32, 16, 8) if e % c == 0), e)
    else:
        te = edge_tile
    assert e % te == 0 and (te % 8 == 0 or te == e)

    # Each fused-weight segment padded to a 128-lane boundary so per-tile
    # slices / concats land on vreg boundaries.
    seg = ((hf + 127) // 128) * 128

    def _expand(scoring):                       # per-head score -> lane-expanded
        sc = scoring.reshape(h, fo).astype(jnp.float32)
        mat = jnp.eye(h, dtype=jnp.float32)[:, None, :, None] * sc[:, :, None, None]
        return jnp.broadcast_to(mat, (h, fo, h, fo)).reshape(hf, hf)

    def _pad_lanes(a, width):
        p = width - a.shape[1]
        return a if p == 0 else jnp.concatenate(
            [a, jnp.zeros((a.shape[0], p), a.dtype)], axis=1)

    w32 = w.astype(jnp.float32)
    # Fused RHS: [W | W@M_src | W@M_trg], each segment 128-lane padded, bf16.
    w_fused = jnp.concatenate(
        [_pad_lanes(w32, seg),
         _pad_lanes(w32 @ _expand(scoring_src), seg),
         _pad_lanes(w32 @ _expand(scoring_trg), seg)],
        axis=1).astype(jnp.bfloat16)                          # (F_in, 3*seg)

    rel_bf = rel.astype(jnp.bfloat16)                         # raw rel, bf16 in HBM
    src = edge_index[:, 0, :].astype(jnp.int32).reshape(b, e, 1)
    trg = edge_index[:, 1, :].astype(jnp.int32).reshape(b, e, 1)
    bias2d = bias.reshape(1, hf).astype(jnp.float32)

    out_lanes = seg
    n_tiles = e // te
    grid = (b, n_tiles)

    # Advisory cost estimate (helps XLA schedule around the kernel).
    flops = b * (2 * n * f_in * 3 * seg
                 + n_tiles * (2 * (2 * te) * n * 3 * seg + 2 * te * n * 3 * seg)
                 + 2 * n * f_in * hf)
    transcendentals = b * (e * seg + n * hf)
    bytes_accessed = (x.size * x.dtype.itemsize + rel_bf.size * 2
                      + 2 * b * e * 4 + w_fused.size * 2 + w32.size * 4
                      + hf * 4 + b * n * out_lanes * x.dtype.itemsize)

    # Explicit VMEM budget (v7x physical VMEM is 64 MiB); generous headroom.
    vmem_est = ((2 + 4) * n * 3 * seg                 # node (bf16) + acc (f32)
                + 8 * n * (f_in + out_lanes)          # x + out blocks, dbl-buffered
                + 4 * te * (f_in + 8)                 # rel + idx tiles
                + 2 * f_in * 3 * seg + 4 * f_in * hf  # weights
                + 3 * te * n * 2                      # one-hot operands (bf16)
                + 3 * te * 3 * seg * 6)               # gather / scat_rhs transients
    vmem_limit = int(min(max(4 * vmem_est, 32 * 1024 * 1024), 64 * 1024 * 1024))

    out = pl.pallas_call(
        _gat_kernel,
        out_shape=jax.ShapeDtypeStruct((b, n, out_lanes), x.dtype),
        grid=grid,
        in_specs=[
            pl.BlockSpec((1, n, f_in), lambda i, t: (i, 0, 0)),      # x (resident)
            pl.BlockSpec((1, te, f_in), lambda i, t: (i, t, 0)),     # rel tile (bf16)
            pl.BlockSpec((1, te, 1), lambda i, t: (i, t, 0)),        # src idx tile
            pl.BlockSpec((1, te, 1), lambda i, t: (i, t, 0)),        # trg idx tile
            pl.BlockSpec((f_in, 3 * seg), lambda i, t: (0, 0)),      # fused W (bf16)
            pl.BlockSpec((f_in, hf), lambda i, t: (0, 0)),           # plain W (rel)
            pl.BlockSpec((1, hf), lambda i, t: (0, 0)),              # bias
        ],
        out_specs=pl.BlockSpec((1, n, out_lanes), lambda i, t: (i, 0, 0)),
        scratch_shapes=[
            pltpu.VMEM((n, 3 * seg), jnp.bfloat16),   # cached [proj|s_src|s_trg]
            pltpu.VMEM((1, seg), jnp.float32),        # hoisted per-head shift
            pltpu.VMEM((n, 3 * seg), jnp.float32),    # [denom | num | rel] accum
        ],
        compiler_params=pltpu.CompilerParams(
            dimension_semantics=("parallel", "arbitrary"),
            vmem_limit_bytes=vmem_limit),
        cost_estimate=pl.CostEstimate(flops=flops,
                                      transcendentals=transcendentals,
                                      bytes_accessed=bytes_accessed),
    )(x, rel_bf, src, trg, w_fused, w32, bias2d)
    return out[..., :hf]


# ----------------------------------------------------------------------------
# Pure-JAX reference (mirrors the torch forward, eval mode) for validation.
# ----------------------------------------------------------------------------
def gat_reference(x, edge_index, rel, w, scoring_src, scoring_trg, bias,
                  *, num_heads, num_out_features):
    b, n, f_in = x.shape
    e = edge_index.shape[2]
    h, fo = num_heads, num_out_features
    src = edge_index[:, 0, :]
    trg = edge_index[:, 1, :]

    proj = (x @ w).reshape(b, n, h, fo)
    rel_proj = (rel @ w).reshape(b, e, h, fo)
    scores_src = (proj * scoring_src.reshape(1, 1, h, fo)).sum(-1)   # (B,N,H)
    scores_trg = (proj * scoring_trg.reshape(1, 1, h, fo)).sum(-1)

    s_src_l = jnp.take_along_axis(scores_src, src[:, :, None], axis=1)   # (B,E,H)
    s_trg_l = jnp.take_along_axis(scores_trg, trg[:, :, None], axis=1)
    lifted = jnp.take_along_axis(proj, src[:, :, None, None], axis=1)    # (B,E,H,Fo)

    s = s_src_l + s_trg_l
    s = jnp.where(s > 0, s, 0.2 * s)
    s = s - s.reshape(b, -1).max(axis=-1)[:, None, None]
    es = jnp.exp(s)

    seg_sum = jax.vmap(
        lambda v, i: jnp.zeros((n,) + v.shape[1:], v.dtype).at[i].add(v))
    denom_nodes = seg_sum(es, trg)                                       # (B,N,H)
    denom_edges = jnp.take_along_axis(denom_nodes, trg[:, :, None], axis=1)
    attn = es / (denom_edges + 1e-16)

    weighted = lifted * attn[..., None] + rel_proj
    out = seg_sum(weighted, trg)                                         # (B,N,H,Fo)
    out = out + x.reshape(b, n, h, fo)            # skip connection
    out = out.reshape(b, n, h * fo) + bias        # concat + bias
    return jnp.where(out > 0, out, jnp.exp(out) - 1.0)   # ELU


# ----------------------------------------------------------------------------
def _xavier_uniform(key, shape, fan_in, fan_out, dtype=jnp.float32):
    limit = float(np.sqrt(6.0 / (fan_in + fan_out)))
    return jax.random.uniform(key, shape, dtype, minval=-limit, maxval=limit)


if __name__ == "__main__":
    B, N, E = 2, 8, 16          # B = 2 keeps both v7x TensorCores busy
    H, F_OUT = 4, 8
    F_IN = H * F_OUT            # 32, so the skip connection is a direct add

    key = jax.random.PRNGKey(0)
    k_x, k_rel, k_e, k_w, k_ss, k_st = jax.random.split(key, 6)

    x = jax.random.normal(k_x, (B, N, F_IN), jnp.float32)
    rel = jax.random.normal(k_rel, (B, E, F_IN), jnp.float32)
    edge_index = jax.random.randint(k_e, (B, 2, E), 0, N, jnp.int32)

    # deterministic parameter init (Glorot-uniform like the torch module)
    w = _xavier_uniform(k_w, (F_IN, H * F_OUT), F_IN, H * F_OUT)  # linear_proj.weight.T
    scoring_src = _xavier_uniform(k_ss, (1, H, F_OUT), H, F_OUT)
    scoring_trg = _xavier_uniform(k_st, (1, H, F_OUT), H, F_OUT)
    bias = jnp.zeros((H * F_OUT,), jnp.float32)

    # edge_tile=8 exercises the multi-tile accumulation path (2 tiles / batch).
    out = gat_layer(x, edge_index, rel, w, scoring_src, scoring_trg, bias,
                    num_heads=H, num_out_features=F_OUT, edge_tile=8)
    out = jax.block_until_ready(out)

    ref = gat_reference(x, edge_index, rel, w, scoring_src, scoring_trg, bias,
                        num_heads=H, num_out_features=F_OUT)
    ref = jax.block_until_ready(ref)

    # bf16 MXU operands (weights, node cache, one-hot gather/scatter, softmax
    # numerator) + approx reciprocal => ~2-3 significant digits on the
    # attention weights; tolerance reflects that while still catching any
    # structural / indexing error (those show up as O(1) differences).
    np.testing.assert_allclose(np.asarray(out), np.asarray(ref),
                               rtol=5e-2, atol=5e-2)
    print("KERNEL_OK")
</pallas_src>

<mosaic_0001>
module attributes {stable_mosaic.version = 11 : i64} {
  func.func @_gat_kernel(%arg0: i32, %arg1: i32, %arg2: memref<1x8x32xf32, #tpu.memory_space<vmem>>, %arg3: memref<1x8x32xbf16, #tpu.memory_space<vmem>>, %arg4: memref<1x8x1xi32, #tpu.memory_space<vmem>>, %arg5: memref<1x8x1xi32, #tpu.memory_space<vmem>>, %arg6: memref<32x384xbf16, #tpu.memory_space<vmem>>, %arg7: memref<32x32xf32, #tpu.memory_space<vmem>>, %arg8: memref<1x32xf32, #tpu.memory_space<vmem>>, %arg9: memref<1x8x128xf32, #tpu.memory_space<vmem>>, %arg10: memref<8x384xbf16, #tpu.memory_space<vmem>>, %arg11: memref<1x128xf32, #tpu.memory_space<vmem>>, %arg12: memref<8x384xf32, #tpu.memory_space<vmem>>) attributes {dimension_semantics = [#tpu.dimension_semantics<parallel>, #tpu.dimension_semantics<arbitrary>], iteration_bounds = array<i64: 2, 2>, scalar_prefetch = 0 : i64, scratch_operands = 3 : i64, tpu.core_type = #tpu.core_type<tc>, window_params = [{transform_indices = @transform_0, window_bounds = array<i64: 1, 8, 32>}, {transform_indices = @transform_1, window_bounds = array<i64: 1, 8, 32>}, {transform_indices = @transform_2, window_bounds = array<i64: 1, 8, 1>}, {transform_indices = @transform_3, window_bounds = array<i64: 1, 8, 1>}, {pipeline_mode = #tpu.pipeline_mode<synchronous>, transform_indices = @transform_4, window_bounds = array<i64: 32, 384>}, {pipeline_mode = #tpu.pipeline_mode<synchronous>, transform_indices = @transform_5, window_bounds = array<i64: 32, 32>}, {pipeline_mode = #tpu.pipeline_mode<synchronous>, transform_indices = @transform_6, window_bounds = array<i64: 1, 32>}, {transform_indices = @transform_7, window_bounds = array<i64: 1, 8, 128>}]} {
    %c0_i32 = arith.constant 0 : i32
    %0 = arith.cmpi eq, %arg1, %c0_i32 : i32
    %1 = arith.extui %0 : i1 to i32
    %c0_i32_0 = arith.constant 0 : i32
    %2 = arith.cmpi ne, %1, %c0_i32_0 : i32
    scf.if %2 {
      %c0_22 = arith.constant 0 : index
      %c0_23 = arith.constant 0 : index
      %c0_24 = arith.constant 0 : index
      %45 = vector.load %arg2[%c0_22, %c0_23, %c0_24] : memref<1x8x32xf32, #tpu.memory_space<vmem>>, vector<1x8x32xf32>
      %46 = vector.shape_cast %45 : vector<1x8x32xf32> to vector<8x32xf32>
      %47 = arith.truncf %46 : vector<8x32xf32> to vector<8x32xbf16>
      %c0_25 = arith.constant 0 : index
      %c0_26 = arith.constant 0 : index
      %48 = vector.load %arg6[%c0_25, %c0_26] : memref<32x384xbf16, #tpu.memory_space<vmem>>, vector<32x384xbf16>
      %cst_27 = arith.constant dense<0.000000e+00> : vector<8x384xf32>
      %49 = tpu.matmul %47, %48, %cst_27 {dimension_numbers = #tpu.dot_dimension_numbers<[1], [0], [0], [1], [0, 0, 1, 1], [], []>} : vector<8x32xbf16>, vector<32x384xbf16>, vector<8x384xf32> -> vector<8x384xf32>
      %50 = arith.truncf %49 : vector<8x384xf32> to vector<8x384xbf16>
      %c0_28 = arith.constant 0 : index
      %c0_29 = arith.constant 0 : index
      %51 = vector.load %arg10[%c0_28, %c0_29] : memref<8x384xbf16, #tpu.memory_space<vmem>>, vector<8x384xbf16>
      tpu.vector_store %arg10[%c0_28, %c0_29], %50 {strides = array<i32>} : memref<8x384xbf16, #tpu.memory_space<vmem>>, vector<8x384xbf16>,
      %52 = vector.extract_strided_slice %49 {offsets = [0, 128], sizes = [8, 128], strides = [1, 1]} : vector<8x384xf32> to vector<8x128xf32>
      %cst_30 = arith.constant dense<0xFF800000> : vector<128xf32>
      %53 = vector.multi_reduction <maximumf>, %52, %cst_30 [0] : vector<8x128xf32> to vector<128xf32>
      %54 = vector.shape_cast %53 : vector<128xf32> to vector<1x128xf32>
      %55 = vector.extract_strided_slice %49 {offsets = [0, 256], sizes = [8, 128], strides = [1, 1]} : vector<8x384xf32> to vector<8x128xf32>
      %cst_31 = arith.constant dense<0xFF800000> : vector<128xf32>
      %56 = vector.multi_reduction <maximumf>, %55, %cst_31 [0] : vector<8x128xf32> to vector<128xf32>
      %57 = vector.shape_cast %56 : vector<128xf32> to vector<1x128xf32>
      %58 = arith.addf %54, %57 : vector<1x128xf32>
      %cst_32 = arith.constant 0.000000e+00 : f32
      %59 = vector.broadcast %cst_32 : f32 to vector<1x128xf32>
      %60 = arith.cmpf ogt, %58, %59 : vector<1x128xf32>
      %cst_33 = arith.constant 2.000000e-01 : f32
      %61 = vector.broadcast %cst_33 : f32 to vector<1x128xf32>
      %62 = arith.mulf %61, %58 : vector<1x128xf32>
      %63 = arith.select %60, %58, %62 : vector<1x128xi1>, vector<1x128xf32>
      %c0_34 = arith.constant 0 : index
      %c0_35 = arith.constant 0 : index
      %64 = vector.load %arg11[%c0_34, %c0_35] : memref<1x128xf32, #tpu.memory_space<vmem>>, vector<1x128xf32>
      tpu.vector_store %arg11[%c0_34, %c0_35], %63 {strides = array<i32>} : memref<1x128xf32, #tpu.memory_space<vmem>>, vector<1x128xf32>,
      %cst_36 = arith.constant 0.000000e+00 : f32
      %65 = vector.broadcast %cst_36 : f32 to vector<8x384xf32>
      %c0_37 = arith.constant 0 : index
      %c0_38 = arith.constant 0 : index
      %66 = vector.load %arg12[%c0_37, %c0_38] : memref<8x384xf32, #tpu.memory_space<vmem>>, vector<8x384xf32>
      tpu.vector_store %arg12[%c0_37, %c0_38], %65 {strides = array<i32>} : memref<8x384xf32, #tpu.memory_space<vmem>>, vector<8x384xf32>,
    } else {
    }
    %c0 = arith.constant 0 : index
    %c0_1 = arith.constant 0 : index
    %3 = vector.load %arg10[%c0, %c0_1] : memref<8x384xbf16, #tpu.memory_space<vmem>>, vector<8x384xbf16>
    %c0_2 = arith.constant 0 : index
    %c0_3 = arith.constant 0 : index
    %4 = vector.load %arg11[%c0_2, %c0_3] : memref<1x128xf32, #tpu.memory_space<vmem>>, vector<1x128xf32>
    %c0_4 = arith.constant 0 : index
    %c0_5 = arith.constant 0 : index
    %c0_6 = arith.constant 0 : index
    %5 = vector.load %arg4[%c0_4, %c0_5, %c0_6] : memref<1x8x1xi32, #tpu.memory_space<vmem>>, vector<1x8x1xi32>
    %6 = vector.shape_cast %5 : vector<1x8x1xi32> to vector<8x1xi32>
    %c0_7 = arith.constant 0 : index
    %c0_8 = arith.constant 0 : index
    %c0_9 = arith.constant 0 : index
    %7 = vector.load %arg5[%c0_7, %c0_8, %c0_9] : memref<1x8x1xi32, #tpu.memory_space<vmem>>, vector<1x8x1xi32>
    %8 = vector.shape_cast %7 : vector<1x8x1xi32> to vector<8x1xi32>
    %9 = tpu.concatenate %6, %8 in 0 : vector<8x1xi32>, vector<8x1xi32> -> vector<16x1xi32>
    %10 = tpu.iota {dimensions = array<i32: 1>} : vector<16x8xi32>
    %11 = vector.broadcast %9 : vector<16x1xi32> to vector<16x8xi32>
    %12 = arith.cmpi eq, %11, %10 : vector<16x8xi32>
    %13 = arith.extui %12 : vector<16x8xi1> to vector<16x8xi32>
    %14 = arith.sitofp %13 : vector<16x8xi32> to vector<16x8xf32>
    %15 = arith.truncf %14 : vector<16x8xf32> to vector<16x8xbf16>
    %cst = arith.constant dense<0.000000e+00> : vector<16x384xf32>
    %16 = tpu.matmul %15, %3, %cst {dimension_numbers = #tpu.dot_dimension_numbers<[1], [0], [0], [1], [0, 0, 1, 1], [], []>} : vector<16x8xbf16>, vector<8x384xbf16>, vector<16x384xf32> -> vector<16x384xf32>
    %17 = vector.extract_strided_slice %16 {offsets = [0, 0], sizes = [8, 128], strides = [1, 1]} : vector<16x384xf32> to vector<8x128xf32>
    %18 = vector.extract_strided_slice %16 {offsets = [0, 128], sizes = [8, 128], strides = [1, 1]} : vector<16x384xf32> to vector<8x128xf32>
    %19 = vector.extract_strided_slice %16 {offsets = [8, 256], sizes = [8, 128], strides = [1, 1]} : vector<16x384xf32> to vector<8x128xf32>
    %20 = arith.addf %18, %19 : vector<8x128xf32>
    %cst_10 = arith.constant 0.000000e+00 : f32
    %21 = vector.broadcast %cst_10 : f32 to vector<8x128xf32>
    %22 = arith.cmpf ogt, %20, %21 : vector<8x128xf32>
    %cst_11 = arith.constant 2.000000e-01 : f32
    %23 = vector.broadcast %cst_11 : f32 to vector<8x128xf32>
    %24 = arith.mulf %23, %20 : vector<8x128xf32>
    %25 = arith.select %22, %20, %24 : vector<8x128xi1>, vector<8x128xf32>
    %26 = vector.broadcast %4 : vector<1x128xf32> to vector<8x128xf32>
    %27 = arith.subf %25, %26 : vector<8x128xf32>
    %28 = math.exp %27 : vector<8x128xf32>
    %c0_12 = arith.constant 0 : index
    %c0_13 = arith.constant 0 : index
    %c0_14 = arith.constant 0 : index
    %29 = vector.load %arg3[%c0_12, %c0_13, %c0_14] : memref<1x8x32xbf16, #tpu.memory_space<vmem>>, vector<1x8x32xbf16>
    %30 = vector.shape_cast %29 : vector<1x8x32xbf16> to vector<8x32xbf16>
    %cst_15 = arith.constant 0.000000e+00 : bf16
    %31 = vector.broadcast %cst_15 : bf16 to vector<8x96xbf16>
    %32 = tpu.concatenate %30, %31 in 1 : vector<8x32xbf16>, vector<8x96xbf16> -> vector<8x128xbf16>
    %33 = arith.truncf %28 : vector<8x128xf32> to vector<8x128xbf16>
    %34 = arith.mulf %17, %28 : vector<8x128xf32>
    %35 = arith.truncf %34 : vector<8x128xf32> to vector<8x128xbf16>
    %36 = tpu.concatenate %33, %35, %32 in 1 : vector<8x128xbf16>, vector<8x128xbf16>, vector<8x128xbf16> -> vector<8x384xbf16>
    %37 = vector.extract_strided_slice %15 {offsets = [8, 0], sizes = [8, 8], strides = [1, 1]} : vector<16x8xbf16> to vector<8x8xbf16>
    %c0_16 = arith.constant 0 : index
    %c0_17 = arith.constant 0 : index
    %38 = vector.load %arg12[%c0_16, %c0_17] : memref<8x384xf32, #tpu.memory_space<vmem>>, vector<8x384xf32>
    %cst_18 = arith.constant dense<0.000000e+00> : vector<8x384xf32>
    %39 = tpu.matmul %37, %36, %cst_18 {dimension_numbers = #tpu.dot_dimension_numbers<[0], [0], [1], [1], [0, 1, 1, 1], [], []>} : vector<8x8xbf16>, vector<8x384xbf16>, vector<8x384xf32> -> vector<8x384xf32>
    %40 = arith.addf %38, %39 : vector<8x384xf32>
    %c0_19 = arith.constant 0 : index
    %c0_20 = arith.constant 0 : index
    %41 = vector.load %arg12[%c0_19, %c0_20] : memref<8x384xf32, #tpu.memory_space<vmem>>, vector<8x384xf32>
    tpu.vector_store %arg12[%c0_19, %c0_20], %40 {strides = array<i32>} : memref<8x384xf32, #tpu.memory_space<vmem>>, vector<8x384xf32>,
    %c1_i32 = arith.constant 1 : i32
    %42 = arith.cmpi eq, %arg1, %c1_i32 : i32
    %43 = arith.extui %42 : i1 to i32
    %c0_i32_21 = arith.constant 0 : i32
    %44 = arith.cmpi ne, %43, %c0_i32_21 : i32
    scf.if %44 {
      %c0_22 = arith.constant 0 : index
      %c0_23 = arith.constant 0 : index
      %45 = vector.load %arg12[%c0_22, %c0_23] : memref<8x384xf32, #tpu.memory_space<vmem>>, vector<8x384xf32>
      %46 = vector.extract_strided_slice %45 {offsets = [0, 0], sizes = [8, 32], strides = [1, 1]} : vector<8x384xf32> to vector<8x32xf32>
      %47 = vector.extract_strided_slice %45 {offsets = [0, 128], sizes = [8, 32], strides = [1, 1]} : vector<8x384xf32> to vector<8x32xf32>
      %48 = vector.extract_strided_slice %45 {offsets = [0, 256], sizes = [8, 32], strides = [1, 1]} : vector<8x384xf32> to vector<8x32xf32>
      %c0_24 = arith.constant 0 : index
      %c0_25 = arith.constant 0 : index
      %49 = vector.load %arg7[%c0_24, %c0_25] : memref<32x32xf32, #tpu.memory_space<vmem>>, vector<32x32xf32>
      %cst_26 = arith.constant dense<0.000000e+00> : vector<8x32xf32>
      %50 = tpu.matmul %48, %49, %cst_26 {dimension_numbers = #tpu.dot_dimension_numbers<[1], [0], [0], [1], [0, 0, 1, 1], [], []>} : vector<8x32xf32>, vector<32x32xf32>, vector<8x32xf32> -> vector<8x32xf32>
      %cst_27 = arith.constant 1.000000e-16 : f32
      %51 = vector.broadcast %cst_27 : f32 to vector<8x32xf32>
      %52 = arith.addf %46, %51 : vector<8x32xf32>
      %53 = tpu.reciprocal %52 {approx = true} : vector<8x32xf32> -> vector<8x32xf32>
      %54 = arith.mulf %47, %53 : vector<8x32xf32>
      %55 = arith.addf %54, %50 : vector<8x32xf32>
      %c0_28 = arith.constant 0 : index
      %c0_29 = arith.constant 0 : index
      %c0_30 = arith.constant 0 : index
      %56 = vector.load %arg2[%c0_28, %c0_29, %c0_30] : memref<1x8x32xf32, #tpu.memory_space<vmem>>, vector<1x8x32xf32>
      %57 = vector.shape_cast %56 : vector<1x8x32xf32> to vector<8x32xf32>
      %58 = arith.addf %55, %57 : vector<8x32xf32>
      %c0_31 = arith.constant 0 : index
      %c0_32 = arith.constant 0 : index
      %59 = vector.load %arg8[%c0_31, %c0_32] : memref<1x32xf32, #tpu.memory_space<vmem>>, vector<1x32xf32>
      %60 = vector.broadcast %59 : vector<1x32xf32> to vector<8x32xf32>
      %61 = arith.addf %58, %60 : vector<8x32xf32>
      %cst_33 = arith.constant 0.000000e+00 : f32
      %62 = vector.broadcast %cst_33 : f32 to vector<8x32xf32>
      %63 = arith.cmpf ogt, %61, %62 : vector<8x32xf32>
      %cst_34 = arith.constant 0.000000e+00 : f32
      %64 = vector.broadcast %cst_34 : f32 to vector<8x32xf32>
      %65 = arith.minimumf %61, %64 : vector<8x32xf32>
      %66 = math.exp %65 : vector<8x32xf32>
      %cst_35 = arith.constant 1.000000e+00 : f32
      %67 = vector.broadcast %cst_35 : f32 to vector<8x32xf32>
      %68 = arith.subf %66, %67 : vector<8x32xf32>
      %69 = arith.select %63, %61, %68 : vector<8x32xi1>, vector<8x32xf32>
      %cst_36 = arith.constant 0.000000e+00 : f32
      %70 = vector.broadcast %cst_36 : f32 to vector<8x96xf32>
      %71 = tpu.concatenate %69, %70 in 1 : vector<8x32xf32>, vector<8x96xf32> -> vector<8x128xf32>
      %c0_37 = arith.constant 0 : index
      %c0_38 = arith.constant 0 : index
      %c0_39 = arith.constant 0 : index
      %72 = vector.load %arg9[%c0_37, %c0_38, %c0_39] : memref<1x8x128xf32, #tpu.memory_space<vmem>>, vector<1x8x128xf32>
      %73 = vector.shape_cast %72 : vector<1x8x128xf32> to vector<8x128xf32>
      %74 = vector.shape_cast %71 : vector<8x128xf32> to vector<1x8x128xf32>
      tpu.vector_store %arg9[%c0_37, %c0_38, %c0_39], %74 {strides = array<i32>} : memref<1x8x128xf32, #tpu.memory_space<vmem>>, vector<1x8x128xf32>,
    } else {
    }
    return
  }
  func.func @transform_0(%arg0: i32, %arg1: i32) -> (i32, i32, i32) {
    %c0_i32 = arith.constant 0 : i32
    %c0_i32_0 = arith.constant 0 : i32
    %c0_i32_1 = arith.constant 0 : i32
    return %arg0, %c0_i32, %c0_i32_0 : i32, i32, i32
  }
  func.func @transform_1(%arg0: i32, %arg1: i32) -> (i32, i32, i32) {
    %c0_i32 = arith.constant 0 : i32
    %c0_i32_0 = arith.constant 0 : i32
    return %arg0, %arg1, %c0_i32 : i32, i32, i32
  }
  func.func @transform_2(%arg0: i32, %arg1: i32) -> (i32, i32, i32) {
    %c0_i32 = arith.constant 0 : i32
    %c0_i32_0 = arith.constant 0 : i32
    return %arg0, %arg1, %c0_i32 : i32, i32, i32
  }
  func.func @transform_3(%arg0: i32, %arg1: i32) -> (i32, i32, i32) {
    %c0_i32 = arith.constant 0 : i32
    %c0_i32_0 = arith.constant 0 : i32
    return %arg0, %arg1, %c0_i32 : i32, i32, i32
  }
  func.func @transform_4(%arg0: i32, %arg1: i32) -> (i32, i32) {
    %c0_i32 = arith.constant 0 : i32
    %c0_i32_0 = arith.constant 0 : i32
    %c0_i32_1 = arith.constant 0 : i32
    return %c0_i32, %c0_i32_0 : i32, i32
  }
  func.func @transform_5(%arg0: i32, %arg1: i32) -> (i32, i32) {
    %c0_i32 = arith.constant 0 : i32
    %c0_i32_0 = arith.constant 0 : i32
    %c0_i32_1 = arith.constant 0 : i32
    return %c0_i32, %c0_i32_0 : i32, i32
  }
  func.func @transform_6(%arg0: i32, %arg1: i32) -> (i32, i32) {
    %c0_i32 = arith.constant 0 : i32
    %c0_i32_0 = arith.constant 0 : i32
    %c0_i32_1 = arith.constant 0 : i32
    return %c0_i32, %c0_i32_0 : i32, i32
  }
  func.func @transform_7(%arg0: i32, %arg1: i32) -> (i32, i32, i32) {
    %c0_i32 = arith.constant 0 : i32
    %c0_i32_0 = arith.constant 0 : i32
    %c0_i32_1 = arith.constant 0 : i32
    return %arg0, %c0_i32, %c0_i32_0 : i32, i32, i32
  }
}

</mosaic_0001>

<bundles_post_ra>
// kernel: gat_layer.1
= control target key start
LH: loop header
LB: loop body
LE: loop exit
PB: predicated region body
PF: predicated region fallthrough
CT: control target
= control target key end

     0   :  { %12 = vsyncpa [#allocation6], 0  ;;  %s1604_s0 = inlined_call_operand.vmem [shape: f32[2,8,32], index: 0, kind: input, shape index: {}]   ;;  %s1605_s1 = inlined_call_operand.vmem [shape: bf16[2,16,32], index: 1, kind: input, shape index: {}]   ;;  %s1606_s2 = inlined_call_operand.vmem [shape: s32[2,16,1], index: 2, kind: input, shape index: {}]   ;;  %s1607_s3 = inlined_call_operand.vmem [shape: s32[2,16,1], index: 3, kind: input, shape index: {}]   ;;  %s1608_s4 = inlined_call_operand.vmem [shape: bf16[32,384], index: 4, kind: input, shape index: {}]   ;;  %s1609_s5 = inlined_call_operand.vmem [shape: f32[32,32], index: 5, kind: input, shape index: {}]   ;;  %s1610_s6 = inlined_call_operand.vmem [shape: f32[1,32], index: 6, kind: input, shape index: {}]   ;;  %s1611_s7 = inlined_call_operand.hbm [shape: f32[2,8,128], index: 7, kind: output, shape index: {}]  }
   0x1   :  { %14 = vsyncpa [#allocation6 + $0x1], 0  ;;  %s1393_s24 = smov 0   ;;  %s1395_s25 = smov 0  }
   0x2   :  { %s1397_s26 = smov 0   ;;  %s1399_s27 = smov 0  }
   0x3   :  { %s1401_s28 = smov 0   ;;  %s1403_s29 = smov 0  }
   0x4   :  { %s1405_s30 = smov 0   ;;  %s1407_s8 = smov 0  }
   0x5 LB: > { %1621 = sst [smem:[#allocation8_spill]] %s1313_s24  ;;  %s1054_s9 = sadd.s32 4294967295, %s1341_s8   ;;  %s1341_s8 = sphi %s1407_s8, %s20_s8   ;;  %s1337_s30 = sphi %s1405_s30, %s1644_s30   ;;  %s1333_s29 = sphi %s1403_s29, %s1640_s29   ;;  %s1329_s28 = sphi %s1401_s28, %s1639_s28   ;;  %s1325_s27 = sphi %s1399_s27, %s1638_s27   ;;  %s1321_s26 = sphi %s1397_s26, %s1637_s26   ;;  %s1317_s25 = sphi %s1395_s25, %s1643_s25   ;;  %s1313_s24 = sphi %s1393_s24, %s1642_s24  }
   0x6   : > { %1622 = sst [smem:[#allocation9_spill]] %s1321_s26  ;;  %s1055_s10 = sadd.s32 4294967294, %s1341_s8  }
   0x7   : > { %1623 = sst [smem:[#allocation10_spill]] %s1333_s29  ;;  %s29_s11 = sadd.s32 1, %s1333_s29 }
   0x8   : > { %1624 = sst [smem:[#allocation11_spill]] %s1337_s30  ;;  %p30_p0 = scmp.ge.s32.totalorder %s29_s11, 2 }
   0x9   : > { %1625 = sst [smem:[#allocation12_spill]] %s1341_s8  ;;  %s32_s12 = sadd.s32 1, %s1337_s30 }
   0xa   : > { %p222_p1 = scmp.ne.s32.totalorder %s1321_s26, %s1317_s25  ;;  %p223_p2 = scmp.eq.s32.totalorder %s1054_s9, 3 }
   0xb   : > { %s1646_s11 = smov (%p30_p0, %s29_s11), 0  ;;  %s1648_s12 = smov (!%p30_p0, %s32_s12), %s1337_s30 }
   0xc   : > { %1626 = sst [smem:[#allocation13_spill]] %s1646_s11  ;;  %p1442_p3 = por %p223_p2, %p222_p1 }
   0xd   : > { %p228_p4 = scmp.ne.s32.totalorder %s1317_s25, %s1313_s24  ;;  %p34_p5 = scmp.ge.s32.totalorder %s1648_s12, 2 }
   0xe   : > { %p229_p6 = scmp.eq.s32.totalorder %s1055_s10, 3  ;;  %p1058_p7 = scmp.ge.s32.totalorder %s1341_s8, 1 }
   0xf   : > { %p296_p8 = scmp.lt.s32.totalorder %s1341_s8, 5  ;;  %s1650_s12 = smov (%p34_p5, %s1648_s12), 0 }
  0x10   : > { %1628 = sst [smem:[#allocation14_spill]] %s1650_s12  ;;  %p1452_p9 = por %p229_p6, %p228_p4 }
  0x11   : > { %p297_p10 = pnand %p1058_p7, %p296_p8  ;;  %s209_s15 = ssub.s32 %s1337_s30, %s1650_s12 }
  0x12   : > { %s1629_s14 = scalar_select %p1452_p9, 1, 0 }
  0x13   : > { %s212_s16 = sadd.s32 1, %s1321_s26  ;;  %p210_p11 = scmp.eq.s32.totalorder %s209_s15, 0 }
  0x14   : > { %1630 = sst [smem:[#allocation15_spill]] %s1629_s14  ;;  %300 = sbr.rel (%p297_p10) target bundleno = 998 (0x3e6), region = 48 }
  0x15   : > { %s1460_s17 = scalar_select %p210_p11, %s1321_s26, %s212_s16  }
  0x16   : > { %s1615_s18 = sand.u32 (!%p297_p10), 1, %s1317_s25   ;;  %p351_p12 = scmp.lt.s32.totalorder (!%p297_p10), %s1329_s28, 1 }
  0x17   : > { %1631 = sst [smem:[#allocation16_spill]] %s1460_s17  ;;  %s1466_s19 = sshll.u32 (!%p297_p10), %s1615_s18, 3 }
  0x18   : > { %p357_p13 = scmp.lt.s32.totalorder (!%p297_p10), %s1325_s27, 1  ;;  %p1067_p0 = scmp.ne.s32.totalorder (!%p297_p10), %s1325_s27, 0 }
  0x1b   : > { %s352_s20 = scalar_select %p351_p12, %s1329_s28, 1 }
  0x1c   : > { %s358_s21 = scalar_select %p357_p13, %s1325_s27, 1 }
  0x1d   : > { %s1060_s22 = sshll.u32 %s352_s20, 3  ;;  %s1061_s23 = sshll.u32 %s352_s20, 1  ;;  %v1229_v0 = vld [vmem:[%s1608_s4 + $0x4] ss:$12 sps:$4 sm:$0xff] (!%p1067_p0)   ;;  %v1343_v1 = vmov (!%p1067_p0), 0.0   ;;  %vm1344_vm0 = vmmov (!%p1067_p0), 0  }
  0x1e   : > { %s1474_s15 = scalar_lea.vmem %s1604_s0, %s1060_s22  ;;  %s360_s16 = sadd.s32 %s1061_s23, %s358_s21  ;;  %1112 = vmatprep.subr.bf16.mxu1 (!%p1067_p0), %v1343_v1  ;;  %543 = vst [vmem:[#allocation4] sm:$0xff] (!%p1067_p0), %v1343_v1  ;;  %544 = vst [vmem:[#allocation4 + $0x8] sm:$0xff] (!%p1067_p0), %v1343_v1  ;;  %v1231_v2 = vld [vmem:[%s1608_s4 + $0x8] ss:$12 sps:$4 sm:$0xff] (!%p1067_p0)   ;;  %1116 = vmatprep.mubr.msk.bf16.mxu1 (!%p1067_p0), %vm1344_vm0, %v1343_v1  ;;  %v1232_v3 = vld [vmem:[%s1608_s4] ss:$12 sps:$4 sm:$0xff] (!%p1067_p0)  }
  0x1f   : > { %s1062_s12 = sshll.u32 %s360_s16, 2  ;;  %s1064_s11 = sshll.u32 %s360_s16, 3  ;;  %545 = vst [vmem:[#allocation4 + $0x10] sm:$0xff] (!%p1067_p0), %v1343_v1  ;;  %430 = vmatprep.subr.bf16.mxu0 (!%p1067_p0), %v1229_v0  ;;  %1113 = vmatpush3.bf16.msra.mxu1 (!%p1067_p0), %v1231_v2  ;;  %v1233_v4 = vld [vmem:[%s1608_s4 + $0x1c] ss:$12 sps:$4 sm:$0xff] (!%p1067_p0)   ;;  %v1345_v5 = vmov (!%p1067_p0), 0  }
  0x20   : > { %s1479_s17 = scalar_lea.vmem %s1605_s1, %s1062_s12  ;;  %s1484_s14 = scalar_lea.vmem %s1606_s2, %s1064_s11  ;;  %462 = vmatprep.mubr.bf16.mxu0 (!%p1067_p0), %v1345_v5  ;;  %431 = vmatpush1.bf16.msra.mxu0 (!%p1067_p0), %v1232_v3  ;;  %v1235_v6 = vld [vmem:[%s1608_s4 + $0x20] ss:$12 sps:$4 sm:$0xff] (!%p1067_p0)   ;;  %v1236_v7 = vld [vmem:[%s1608_s4 + $0x18] ss:$12 sps:$4 sm:$0xff] (!%p1067_p0)   ;;  %vm426_vm1 = vcmask (!%p1067_p0), 261120  }
  0x21   : > { %s1489_s8 = scalar_lea.vmem %s1607_s3, %s1064_s11  ;;  %s350_s22 = scalar_lea.vmem [#allocation5], %s1466_s19  ;;  %1114 = vmatprep.subr.bf16.mxu1 (!%p1067_p0), %v1343_v1  ;;  %v384_v8 = vld [vmem:[%s1474_s15] sm:$0xff] (!%p1067_p0)  ;;  %432 = vmatprep.subr.bf16.mxu0 (!%p1067_p0), %v1233_v4 }
  0x22   : > { %383 = sbr.rel (%p1067_p0) target bundleno = 270 (0x10e), region = 52  ;;  %v385_v9 = vpack.c.bf16 (!%p1067_p0), %v384_v8, %v384_v8 }
  0x23   : > { %1115 = vmatpush3.bf16.msra.mxu1 (!%p1067_p0), %v1235_v6 }
  0x24   : > { %433 = vmatpush1.bf16.msra.mxu0 (!%p1067_p0), %v1236_v7 }
  0x26   : > { %1117 = vmatmul.mubr.msk.bf16.vlgmr.msra.gmra.mrb[0].mxu1 (!%p1067_p0), %vm426_vm1, %v385_v9 }
  0x27   : > { %1074 = vmatmul.mubr.msk.bf16.vlgmr.msra.gmra.mrb[0].mxu0 (!%p1067_p0), %vm426_vm1, %v385_v9 }
  0xf9   : > { %v505_v10 = vpop.f32.mrb[0].mxu1 }
  0xfa   : > { %v1099_v11 = vpack.c.bf16 %v505_v10, %v505_v10  ;;  %v532_v12 = vrot.slane %v505_v10, 4  ;;  %v464_v13 = vpop.f32.mrb[0].mxu0  ;;  %v1118_v14 = vpop.f32.mrb[1].mxu1 }
  0xfb   : > { %v466_v15 = vpop.f32.mrb[1].mxu0  ;;  %v508_v16 = vpop.f32.mrb[2].mxu1 }
  0xfc   : > { %525 = vst [vmem:[#allocation2 + $0x8] sm:$0xf] %v1099_v11  ;;  %v533_v17 = vmax.f32 %v505_v10, %v532_v12  ;;  %v1098_v18 = vpack.c.bf16 %v466_v15, %v464_v13  ;;  %v526_v19 = vrot.slane %v466_v15, 4  ;;  %v468_v20 = vpop.f32.mrb[2].mxu0  ;;  %v1119_v21 = vpop.f32.mrb[3].mxu1 }
  0xfd   : > { %v469_v22 = vpop.f32.mrb[3].mxu0 }
  0xfe   : > { %v534_v23 = vrot.slane %v533_v17, 2  ;;  %524 = vst [vmem:[#allocation2] sm:$0xff] %v1098_v18  ;;  %v527_v24 = vmax.f32 %v466_v15, %v526_v19 }
 0x100   : > { %v535_v25 = vmax.f32 %v533_v17, %v534_v23  ;;  %v528_v26 = vrot.slane %v527_v24, 2 }
 0x102   : > { %v536_v27 = vrot.slane %v535_v25, 1  ;;  %v529_v28 = vmax.f32 %v527_v24, %v528_v26 }
 0x104   : > { %v530_v29 = vrot.slane %v529_v28, 1  ;;  %v537_v30 = vmax.f32 %v535_v25, %v536_v27 }
 0x106   : > { %v531_v31 = vmax.f32 %v529_v28, %v530_v29 }
 0x108   : > { %v538_v32 = vadd.f32 %v537_v30, %v531_v31 }
 0x10a   : > { %vm539_vm2 = vcmp.gt.f32.partialorder %v538_v32, 0.0  ;;  %v540_v33 = vmul.f32 0.2, %v538_v32 }
 0x10c   : > { %v541_v34 = vsel %vm539_vm2, %v538_v32, %v540_v33 }
 0x10d   : > { %542 = vst [vmem:[#allocation3] sm:$0x1] %v541_v34 }
 0x10e PF: > { %v549_v35 = vld [vmem:[%s1484_s14] sm:$0xff]  ;;  %v1346_v36 = vmov 0   ;;  %v1347_v37 = vmov 0.0   ;;  %v1240_v42 = vld [vmem:[#allocation2 + $0x8] ss:$0 sps:$4 sm:$0xff]   ;;  %vm578_vm3 = vcmask 1043456   ;;  %v551_v45 = vlaneseq }
 0x10f   : > { %1237 = vset.pattern.permute.xlu0 %v1346_v36  ;;  %1120 = vmatprep.subr.bf16.mxu1 %v1347_v37  ;;  %v550_v38 = vld [vmem:[%s1489_s8] sm:$0xff]  ;;  %v586_v44 = vsel %vm578_vm3, %v1240_v42, 0  ;;  %vm1348_vm4 = vmmov 0   ;;  %vm574_vm7 = vcmask 64512   ;;  %vm683_vm8 = vcmask 261120   ;;  %v690_v18 = vld [vmem:[#allocation4] sm:$0xff] }
 0x110   : > { %554 = vperm.xlu0 %1237, %v549_v35   ;;  %620 = vmatprep.mubr.bf16.mxu0 %v1346_v36  ;;  %v546_v39 = vld [vmem:[#allocation2] sm:$0xff]  ;;  %v552_v46 = vand.u32 127, %v551_v45  ;;  %v691_v19 = vld [vmem:[#allocation4 + $0x8] sm:$0xff]  ;;  %p1090_p1 = scmp.ne.s32.totalorder %s1325_s27, 1 }
 0x111   : > { %v1081_v40 = vcombine.high %v546_v39, %v546_v39  ;;  %v1080_v41 = vcombine.low %v546_v39, %v546_v39  ;;  %1121 = vmatpush3.bf16.msra.mxu1 %v586_v44  ;;  %1122 = vmatprep.mubr.msk.bf16.mxu1 %vm1348_vm4, %v1347_v37  ;;  %v682_v53 = vld [vmem:[%s1479_s17] sm:$0xf]  ;;  %v818_v27 = vld [vmem:[%s1609_s5 + $0x8] sm:$0xff] (!%p1090_p1)  ;;  %v819_v28 = vld [vmem:[%s1609_s5 + $0x10] sm:$0xff] (!%p1090_p1)  ;;  %v1349_v29 = vmov (!%p1090_p1), 0.0|0.0   ;;  %vm1350_vm10 = vmmov (!%p1090_p1), 0  }
 0x112   : > { %1126 = vmatprep.subr.bf16.mxu1 %v1347_v37  ;;  %v686_v54 = vsel %vm683_vm8, %v682_v53, 0  ;;  %v692_v15 = vld [vmem:[#allocation4 + $0x10] sm:$0xff]  ;;  %v1351_v32 = vmov (!%p1090_p1), 0.0  }
 0x113   : > { %1083 = vmatprep.subr.msk.bf16.mxu0 %vm578_vm3, %v1081_v40  ;;  %v580_v43 = vsel %vm578_vm3, %v1080_v41, 0  ;;  %v721_v55 = vsel %vm578_vm3, %v686_v54, 0  ;;  %v817_v26 = vld [vmem:[%s1609_s5] sm:$0xff] (!%p1090_p1)  ;;  %v820_v31 = vld [vmem:[%s1609_s5 + $0x18] sm:$0xff] (!%p1090_p1) }
 0x114   : > { %557 = vperm.xlu0 %1237, %v550_v38   ;;  %589 = vmatpush1.bf16.msra.mxu0 %v580_v43  ;;  %v1086_v2 = vld [vmem:[#allocation3] ss:$0 sm:$0xff]  ;;  %v1144_v30 = vpack.c.bf16 (!%p1090_p1), %v818_v27, %v817_v26  ;;  %v1147_v33 = vpack.c.bf16 (!%p1090_p1), %v820_v31, %v819_v28  ;;  %v898_v41 = vld [vmem:[%s1474_s15] sm:$0xff] (!%p1090_p1) }
 0x115   : > { %v1092_v44 = vld [vmem:[%s1610_s6] ss:$0 sm:$0xff] (!%p1090_p1) }
 0x18f   : > { %v555_v47 = vpop.permute.xlu0 %554 }
 0x190   : > { %vm559_vm5 = vcmp.eq.s32.totalorder %v555_v47, %v552_v46 }
 0x191   : > { %v1078_v49 = vsel %vm559_vm5, 1.0, %v1347_v37 }
 0x193   : > { %v558_v48 = vpop.permute.xlu0 %557 }
 0x194   : > { %vm560_vm6 = vcmp.eq.s32.totalorder %v558_v48, %v552_v46 }
 0x195   : > { %v1079_v50 = vsel %vm560_vm6, 1.0, %v1347_v37 }
 0x196   : > { %v565_v51 = vpack.c.bf16 %v1079_v50, %v1078_v49 }
 0x198   : > { %1084 = vmatmul.mubr.msk.bf16.vlgmr.msra.gmra.mrb[0].mxu0 %vm574_vm7, %v565_v51  ;;  %1123 = vmatmul.mubr.msk.bf16.vlgmr.msra.gmra.mrb[0].mxu1 %vm574_vm7, %v565_v51  ;;  %v694_v52 = vrot.slane %v565_v51, 4 }
 0x199   : > { %755 = vmatprep.mubr.bf16.mxu0 %v1346_v36  ;;  %1128 = vmatprep.mubr.msk.bf16.mxu1 %vm1348_vm4, %v1347_v37 }
 0x19a   : > { %696 = vxpose.xlu1.c.b16.start.end [1/1] (short) (narrow) %v694_v52, 16  ;;  %1127 = vmatpush3.bf16.msra.mxu1 %v721_v55 }
 0x200   : > { %v704_v56 = vpop.trf.xlu1 }
 0x201   : > { %1129 = vmatmul.mubr.msk.bf16.vlgmr.msra.gmra.mrb[4].mxu1 %vm574_vm7, %v704_v56 }
 0x26b   : > { %v622_v57 = vpop.f32.mrb[0].mxu0  ;;  %v663_v58 = vpop.f32.mrb[0].mxu1 }
 0x26c   : > { %v624_v59 = vpop.f32.mrb[1].mxu0  ;;  %v1124_v60 = vpop.f32.mrb[1].mxu1 }
 0x26d   : > { %v626_v61 = vpop.f32.mrb[2].mxu0  ;;  %v665_v62 = vpop.f32.mrb[2].mxu1 }
 0x26e   : > { %v669_v63 = vadd.f32 %v665_v62, %v624_v59  ;;  %v627_v0 = vpop.f32.mrb[3].mxu0  ;;  %v1125_v1 = vpop.f32.mrb[3].mxu1 }
 0x270   : > { %vm670_vm9 = vcmp.gt.f32.partialorder %v669_v63, 0.0  ;;  %v671_v3 = vmul.f32 0.2, %v669_v63 }
 0x272   : > { %v672_v4 = vsel %vm670_vm9, %v669_v63, %v671_v3 }
 0x273   : > { %v679_v5 = vsub.f32 %v672_v4, %v1086_v2 }
 0x275   : > { %v680_v6 = vmul.f32 1.442695, %v679_v5 }
 0x277   : > { %1241 = vpow2.f32 %v680_v6 }
 0x281   : > { %v1242_v7 = vpop.eup %1241 }
 0x282   : > { %v688_v8 = vmul.f32 %v1242_v7, %v622_v57  ;;  %v687_v9 = vpack.c.bf16 %v1242_v7, %v1242_v7 }
 0x284   : > { %v689_v10 = vpack.c.bf16 %v688_v8, %v688_v8  ;;  %v716_v11 = vsel %vm578_vm3, %v687_v9, 0 }
 0x286   : > { %1087 = vmatprep.subr.msk.bf16.mxu0 %vm578_vm3, %v689_v10 }
 0x287   : > { %724 = vmatpush1.bf16.msra.mxu0 %v716_v11 }
 0x288   : > { %1143 = vmatprep.subr.bf16.mxu0 (!%p1090_p1), %v1349_v29 }
 0x28a   : > { %1088 = vmatmul.mubr.msk.bf16.vlgmr.msra.gmra.mrb[4].mxu0 %vm574_vm7, %v704_v56 }
 0x28b   : > { %1140 = vmatprep.mubr.msk.f32.mxu0 (!%p1090_p1), %vm1350_vm10, %v1351_v32  ;;  %1145 = vmatpush3.bf16.msra.mxu0 (!%p1090_p1), %v1144_v30 }
 0x28c   : > { %1146 = vmatprep.subr.bf16.mxu0 (!%p1090_p1), %v1349_v29 }
 0x28f   : > { %1148 = vmatpush3.bf16.msra.mxu0 (!%p1090_p1), %v1147_v33 }
 0x2d4   : > { %v798_v12 = vpop.f32.mrb[4].mxu1 }
 0x2d5   : > { %v1130_v13 = vpop.f32.mrb[5].mxu1  ;;  %v806_v17 = vadd.f32 %v798_v12, %v692_v15 }
 0x2d6   : > { %v801_v14 = vpop.f32.mrb[6].mxu1 }
 0x2d7   : > { %v1131_v16 = vpop.f32.mrb[7].mxu1  ;;  %809 = vst [vmem:[#allocation4 + $0x10] sm:$0xff] %v806_v17 }
 0x2de   : > { %v816_v34 = vld [vmem:[#allocation4 + $0x10] sm:$0xff] (!%p1090_p1) }
 0x2df   : > { %1141 = vmatmul.mubr.msk.f32.vlgmr.msra.gmra.mrb[0].mxu0 (!%p1090_p1), %vm683_vm8, %v816_v34 }
 0x35b   : > { %813 = sbr.rel (%p1090_p1) target bundleno = 973 (0x3cd), region = 56 }
 0x35d   : > { %v757_v20 = vpop.f32.mrb[4].mxu0 }
 0x35e   : > { %v804_v21 = vadd.f32 %v757_v20, %v690_v18  ;;  %v759_v22 = vpop.f32.mrb[5].mxu0 }
 0x35f   : > { %v805_v23 = vadd.f32 %v759_v22, %v691_v19  ;;  %v761_v24 = vpop.f32.mrb[6].mxu0 }
 0x360   : > { %807 = vst [vmem:[#allocation4] sm:$0xff] %v804_v21  ;;  %v762_v25 = vpop.f32.mrb[7].mxu0 }
 0x361   : > { %808 = vst [vmem:[#allocation4 + $0x8] sm:$0xff] %v805_v23 }
 0x367   : > { %v814_v35 = vld [vmem:[#allocation4] sm:$0xff] }
 0x368   : > { %v894_v36 = vadd.f32 1e-16, %v814_v35  ;;  %v815_v38 = vld [vmem:[#allocation4 + $0x8] sm:$0xff] }
 0x36a   : > { %1243 = vrcp.f32 %v894_v36 }
 0x374   : > { %v1244_v37 = vpop.eup %1243 }
 0x375   : > { %v896_v39 = vmul.f32 %v1244_v37, %v815_v38 }
 0x3b2   : > { %v890_v40 = vpop.f32.mrb[0].mxu0 }
 0x3b3   : > { %v897_v42 = vadd.f32 %v896_v39, %v890_v40  ;;  %v1142_v43 = vpop.f32.mrb[1].mxu0 }
 0x3b5   : > { %v899_v45 = vadd.f32 %v898_v41, %v897_v42 }
 0x3b7   : > { %v907_v46 = vadd.f32 %v1092_v44, %v899_v45 }
 0x3b9   : > { %v909_v47 = vmin.f32 %v907_v46, 0.0  ;;  %vm908_vm11 = vcmp.gt.f32.partialorder %v907_v46, 0.0 }
 0x3bb   : > { %v910_v48 = vmul.f32 1.442695, %v909_v47 }
 0x3bd   : > { %1245 = vpow2.f32 %v910_v48 }
 0x3c7   : > { %v1246_v49 = vpop.eup %1245 }
 0x3c8   : > { %v1093_v50 = vadd.f32 -1.0, %v1246_v49 }
 0x3ca   : > { %v913_v51 = vsel %vm908_vm11, %v907_v46, %v1093_v50 }
 0x3cb   : > { %v914_v52 = vsel %vm683_vm8, %v913_v51, 0.0 }
 0x3cc   : > { %915 = vst [vmem:[%s350_s22] sm:$0xff] %v914_v52 }
 0x3cd PF: > { %s1095_s15 = sshll.u32 %s1329_s28, 7  ;;  %s930_s18 = sshll.u32 %s350_s22, 4  ;;  %s931_s18 = int_to_ptr.vmem [resolvable:$true] %s930_s18 }
 0x3ce   : > { %s1553_s12 = scalar_lea.hbm %s1611_s7, %s1095_s15  ;;  %s1632_s9 = sand.u32 1, %s1317_s25  }
 0x3cf   : > { %s917_s10 = scalar_lea.sflag [#allocation6], %s1632_s9  ;;  %s1247_s16 = scalar_lea.vmem %s931_s18, 128 }
 0x3d0   : > { %p1248_p2 = scmp.ne.s32.totalorder %s931_s18, %s1247_s16  ;;  %s1352_s8 = smov [#allocation5]  }
 0x3d1   : > { %s1251_s14 = sshll.u32 %s1352_s8, 4  ;;  %s1252_s14 = int_to_ptr.vmem [resolvable:$false] %s1251_s14 }
 0x3d2   : > { %p1249_p4 = pnand %p1248_p2, %p1442_p3  ;;  %s1253_s17 = scalar_lea.vmem %s1252_s14, 256 }
 0x3d3   : > { %p1254_p6 = scmp.lt.s32.totalorder %s931_s18, %s1252_s14  ;;  %p1255_p7 = scmp.lt.s32.totalorder %s1253_s17, %s1247_s16 }
 0x3d4   : > { %p1250_p5 = pneg %p1249_p4 }
 0x3d5   : > { %p1256_p8 = por %p1255_p7, %p1254_p6 }
 0x3d7   : > { %p1257_p10 = pnand %p1256_p8, %p1250_p5 }
 0x3d9   : > { %1260 = shalt.err (!%p1257_p10)
}
 0x3da   : > { %s1261_s28 = scalar_lea.hbm %s1553_s12, 128  ;;  %s1265_s20 = scalar_lea.hbm %s1611_s7, 256 }
 0x3db   : > { %p1262_p11 = scmp.ne.s32.totalorder %s1553_s12, %s1261_s28  ;;  %p1266_p0 = scmp.lt.u32.totalorder %s1553_s12, %s1611_s7 }
 0x3dc   : > { %p1267_p1 = scmp.lt.u32.totalorder %s1265_s20, %s1261_s28  ;;  %p1269_p4 = scmp.lt.u32.totalorder %s1261_s28, %s1553_s12 }
 0x3dd   : > { %p1263_p12 = pnand %p1262_p11, %p1442_p3 }
 0x3de   : > { %p1268_p2 = por %p1267_p1, %p1266_p0 }
 0x3df   : > { %p1264_p13 = pneg %p1263_p12 }
 0x3e0   : > { %p1270_p5 = por %p1269_p4, %p1268_p2 }
 0x3e2   : > { %p1271_p6 = pnand %p1270_p5, %p1264_p13 }
 0x3e4   : > { %1274 = shalt.err (!%p1271_p6)
}
 0x3e5   : > { %1149 = dma.vmem_to_hbm [thread:$0]  (%p1442_p3), %s931_s18, 128, %s1553_s12, %s917_s10  }
 0x3e6 PF: > { %s1633_s26 = sld [smem:[#allocation12_spill]]  ;;  %s1634_s29 = sld [smem:[#allocation8_spill]] }
 0x3ec   : > { %p1155_p7 = scmp.ge.s32.totalorder %s1633_s26, 2  ;;  %s942_s24 = sand.u32 1, %s1634_s29  }
 0x3ed   : > { %s943_s15 = scalar_lea.sflag [#allocation6], %s942_s24 }
 0x3ee   : > { %p1152_p8 = pnand %p1155_p7, %p1452_p9 }
 0x3f0   : > { %1308 = dma.done.wait (!%p1152_p8), %s943_s15, 128  }
 0x3f1   : > { %1310 = vsyncadd (!%p1152_p8), %s943_s15, 4294967168  ;;  %s20_s8 = sadd.s32 1, %s1633_s26   ;;  %s1636_s30 = sld [smem:[#allocation9_spill]] }
 0x3f2   : > { %p17_p10 = scmp.ge.s32.totalorder %s20_s8, 6   ;;  %s1637_s26 = sld [smem:[#allocation16_spill]] }
 0x3f3   : > { %s1638_s27 = sld [smem:[#allocation10_spill]]  ;;  %s1639_s28 = sld [smem:[#allocation11_spill]] }
 0x3f4   : > { %s1640_s29 = sld [smem:[#allocation13_spill]]  ;;  %s1641_s13 = sld [smem:[#allocation14_spill]] }
 0x3f5   : > { %s1642_s24 = smov %s1317_s25  ;;  %19 = sbr.rel (!%p17_p10) target bundleno = 5 (0x5), region = 100 }
 0x3f7   : > { %s1643_s25 = smov %s1636_s30 }
 0x3fa   : > { %s1644_s30 = smov %s1641_s13 }
 0x3fc   :  { %948 = vsyncpa [#allocation6], 1 }
 0x3fd   :  { %950 = vsyncpa [#allocation6 + $0x1], 1 }

</bundles_post_ra>
